<compile_context>
chip_gen: v5e
topology: v5e:2x2
jax: 0.10.0
libtpu: 0.0.40
codegen_flags: <defaults>
</compile_context>

<pallas_src>
import math
import jax
import jax.numpy as jnp
from jax.experimental import pallas as pl
from jax.experimental.pallas import tpu as pltpu


def relation_kernel(x_ref, w1_ref, b1_ref, w2_ref, b2_ref, o_ref):
    # x_ref : (TB, IN)    current batch tile (bf16/f32 MXU operand)
    # w1_ref: (IN, H)     full fc1 weight, resident across the grid
    # b1_ref: (1, H)      fc1 bias (f32)
    # w2_ref: (1, H)      fc2 weight as a row vector (f32)
    # b2_ref: (1, 1)      fc2 bias, SMEM scalar
    # o_ref : (1, 1, TB)  lane-dense output row for this batch tile
    h = jnp.dot(x_ref[...], w1_ref[...], preferred_element_type=jnp.float32)  # MXU
    h = jnp.maximum(h + b1_ref[...], 0.0)                                     # f32 bias + ReLU (VPU)

    # fc2: contract H of (1,H) against H of (TB,H) -> (1, TB).
    # Produces a lane-dense row directly: no N=1 matmul, no masked column stores.
    z = jax.lax.dot_general(
        w2_ref[...], h,
        dimension_numbers=(((1,), (1,)), ((), ())),
        preferred_element_type=jnp.float32)                                   # (1, TB)
    z = z + b2_ref[0, 0]                                                      # SMEM scalar bias
    o_ref[...] = jax.nn.sigmoid(z)[None, :, :].astype(o_ref.dtype)            # EUP sigmoid


def relation_network(x, w1, b1, w2, b2, *, tb=512, mxu_dtype=jnp.bfloat16,
                     vmem_limit_bytes=48 * 1024 * 1024):
    """sigmoid(relu(x @ W1 + b1) @ W2 + b2); x: [B, input_size] -> [B, 1]."""
    B, IN = x.shape
    H = w1.shape[1]
    out_dtype = x.dtype

    # Big batch tiles amortize per-grid-step overhead and fill MXU rows.
    # Clamp to ~next_pow2(B) (>=128, a multiple of 128) and pad the batch so any B works.
    tb = int(min(tb, max(128, pl.next_power_of_2(B))))
    G = pl.cdiv(B, tb)
    Bp = G * tb
    if Bp != B:
        x = jnp.pad(x, ((0, Bp - B), (0, 0)))

    # bf16 MXU operands (f32 accumulate); all elementwise work stays f32.
    if mxu_dtype is not None:
        x = x.astype(mxu_dtype)
        w1 = w1.astype(mxu_dtype)

    b1_2d = b1.reshape(1, H).astype(jnp.float32)
    w2_row = w2.reshape(1, H).astype(jnp.float32)   # (H,1)/(H,) -> row vector
    b2_2d = b2.reshape(1, 1).astype(jnp.float32)

    out = pl.pallas_call(
        relation_kernel,
        out_shape=jax.ShapeDtypeStruct((G, 1, tb), out_dtype),
        grid_spec=pltpu.PrefetchScalarGridSpec(
            num_scalar_prefetch=0,
            grid=(G,),
            in_specs=[
                pl.BlockSpec((tb, IN), lambda i: (i, 0)),           # x: tiled over batch
                pl.BlockSpec((IN, H), lambda i: (0, 0)),            # W1: full, resident
                pl.BlockSpec((1, H), lambda i: (0, 0)),             # b1
                pl.BlockSpec((1, H), lambda i: (0, 0)),             # W2 row
                pl.BlockSpec(memory_space=pltpu.MemorySpace.SMEM),  # b2 scalar
            ],
            out_specs=pl.BlockSpec((1, 1, tb), lambda i: (i, 0, 0)),
        ),
        compiler_params=pltpu.CompilerParams(
            dimension_semantics=("parallel",),    # batch tiles shard across TCs on v7x
            vmem_limit_bytes=vmem_limit_bytes,    # > 16/32 MiB scoped defaults, < 64 MiB
        ),
    )(x, w1, b1_2d, w2_row, b2_2d)

    # (G, 1, tb) -> (Bp, 1) -> drop padded rows.
    return out.reshape(Bp, 1)[:B]


def init_params(key, input_size, hidden_size):
    """Deterministic init mirroring nn.Linear's default U(-1/sqrt(fan_in), +1/sqrt(fan_in))."""
    k1, k2, k3, k4 = jax.random.split(key, 4)
    bound1 = 1.0 / math.sqrt(input_size)
    bound2 = 1.0 / math.sqrt(hidden_size)
    w1 = jax.random.uniform(k1, (input_size, hidden_size), jnp.float32, -bound1, bound1)
    b1 = jax.random.uniform(k2, (hidden_size,), jnp.float32, -bound1, bound1)
    w2 = jax.random.uniform(k3, (hidden_size, 1), jnp.float32, -bound2, bound2)
    b2 = jax.random.uniform(k4, (1,), jnp.float32, -bound2, bound2)
    return w1, b1, w2, b2


if __name__ == "__main__":
    input_size = 64
    hidden_size = 64
    batch = 300  # deliberately not a multiple of the tile -> exercises batch padding

    key = jax.random.PRNGKey(0)
    kx, kp = jax.random.split(key)
    x = jax.random.normal(kx, (batch, input_size), jnp.float32)
    w1, b1, w2, b2 = init_params(kp, input_size, hidden_size)

    out = relation_network(x, w1, b1, w2, b2, tb=128)
    out = jax.block_until_ready(out)

    # Reference in plain JAX, applying the same bf16 rounding to the MXU operands.
    xb = x.astype(jnp.bfloat16).astype(jnp.float32)
    w1b = w1.astype(jnp.bfloat16).astype(jnp.float32)
    h = jnp.maximum(jnp.dot(xb, w1b, precision=jax.lax.Precision.HIGHEST) + b1, 0.0)
    ref = jax.nn.sigmoid(jnp.dot(h, w2, precision=jax.lax.Precision.HIGHEST) + b2)

    assert out.shape == (batch, 1)
    err = float(jnp.max(jnp.abs(out - ref)))
    assert err < 2e-2, f"max abs err {err}"
    print("KERNEL_OK")
</pallas_src>

<mosaic_0001>
module attributes {stable_mosaic.version = 11 : i64} {
  func.func @relation_kernel(%arg0: i32, %arg1: memref<128x64xbf16, #tpu.memory_space<vmem>>, %arg2: memref<64x64xbf16, #tpu.memory_space<vmem>>, %arg3: memref<1x64xf32, #tpu.memory_space<vmem>>, %arg4: memref<1x64xf32, #tpu.memory_space<vmem>>, %arg5: memref<1x1xf32, #tpu.memory_space<smem>>, %arg6: memref<1x1x128xf32, #tpu.memory_space<vmem>>) attributes {dimension_semantics = [#tpu.dimension_semantics<parallel>], iteration_bounds = array<i64: 3>, scalar_prefetch = 0 : i64, scratch_operands = 0 : i64, tpu.core_type = #tpu.core_type<tc>, window_params = [{transform_indices = @transform_0, window_bounds = array<i64: 128, 64>}, {pipeline_mode = #tpu.pipeline_mode<synchronous>, transform_indices = @transform_1, window_bounds = array<i64: 64, 64>}, {pipeline_mode = #tpu.pipeline_mode<synchronous>, transform_indices = @transform_2, window_bounds = array<i64: 1, 64>}, {pipeline_mode = #tpu.pipeline_mode<synchronous>, transform_indices = @transform_3, window_bounds = array<i64: 1, 64>}, {transform_indices = @transform_4, window_bounds = array<i64: 1, 1>}, {transform_indices = @transform_5, window_bounds = array<i64: 1, 1, 128>}]} {
    %c0 = arith.constant 0 : index
    %c0_0 = arith.constant 0 : index
    %0 = vector.load %arg1[%c0, %c0_0] : memref<128x64xbf16, #tpu.memory_space<vmem>>, vector<128x64xbf16>
    %c0_1 = arith.constant 0 : index
    %c0_2 = arith.constant 0 : index
    %1 = vector.load %arg2[%c0_1, %c0_2] : memref<64x64xbf16, #tpu.memory_space<vmem>>, vector<64x64xbf16>
    %cst = arith.constant dense<0.000000e+00> : vector<128x64xf32>
    %2 = tpu.matmul %0, %1, %cst {dimension_numbers = #tpu.dot_dimension_numbers<[1], [0], [0], [1], [0, 0, 1, 1], [], []>} : vector<128x64xbf16>, vector<64x64xbf16>, vector<128x64xf32> -> vector<128x64xf32>
    %c0_3 = arith.constant 0 : index
    %c0_4 = arith.constant 0 : index
    %3 = vector.load %arg3[%c0_3, %c0_4] : memref<1x64xf32, #tpu.memory_space<vmem>>, vector<1x64xf32>
    %4 = vector.broadcast %3 : vector<1x64xf32> to vector<128x64xf32>
    %5 = arith.addf %2, %4 : vector<128x64xf32>
    %cst_5 = arith.constant 0.000000e+00 : f32
    %6 = vector.broadcast %cst_5 : f32 to vector<128x64xf32>
    %7 = arith.maximumf %5, %6 : vector<128x64xf32>
    %c0_6 = arith.constant 0 : index
    %c0_7 = arith.constant 0 : index
    %8 = vector.load %arg4[%c0_6, %c0_7] : memref<1x64xf32, #tpu.memory_space<vmem>>, vector<1x64xf32>
    %cst_8 = arith.constant dense<0.000000e+00> : vector<1x128xf32>
    %9 = tpu.matmul %8, %7, %cst_8 {dimension_numbers = #tpu.dot_dimension_numbers<[1], [1], [0], [0], [0, 0, 1, 0], [], []>} : vector<1x64xf32>, vector<128x64xf32>, vector<1x128xf32> -> vector<1x128xf32>
    %c0_9 = arith.constant 0 : index
    %c0_10 = arith.constant 0 : index
    %10 = memref.load %arg5[%c0_9, %c0_10] : memref<1x1xf32, #tpu.memory_space<smem>>
    %11 = vector.broadcast %10 : f32 to vector<1x128xf32>
    %12 = arith.addf %9, %11 : vector<1x128xf32>
    %13 = arith.negf %12 : vector<1x128xf32>
    %14 = math.exp %13 : vector<1x128xf32>
    %cst_11 = arith.constant 1.000000e+00 : f32
    %15 = vector.broadcast %cst_11 : f32 to vector<1x128xf32>
    %16 = arith.addf %15, %14 : vector<1x128xf32>
    %17 = arith.divf %15, %16 : vector<1x128xf32>
    %18 = vector.shape_cast %17 : vector<1x128xf32> to vector<1x1x128xf32>
    %c0_12 = arith.constant 0 : index
    %c0_13 = arith.constant 0 : index
    %c0_14 = arith.constant 0 : index
    %19 = vector.load %arg6[%c0_12, %c0_13, %c0_14] : memref<1x1x128xf32, #tpu.memory_space<vmem>>, vector<1x1x128xf32>
    tpu.vector_store %arg6[%c0_12, %c0_13, %c0_14], %18 {strides = array<i32>} : memref<1x1x128xf32, #tpu.memory_space<vmem>>, vector<1x1x128xf32>,
    return
  }
  func.func @transform_0(%arg0: i32) -> (i32, i32) {
    %c0_i32 = arith.constant 0 : i32
    %c0_i32_0 = arith.constant 0 : i32
    return %arg0, %c0_i32 : i32, i32
  }
  func.func @transform_1(%arg0: i32) -> (i32, i32) {
    %c0_i32 = arith.constant 0 : i32
    %c0_i32_0 = arith.constant 0 : i32
    %c0_i32_1 = arith.constant 0 : i32
    return %c0_i32, %c0_i32_0 : i32, i32
  }
  func.func @transform_2(%arg0: i32) -> (i32, i32) {
    %c0_i32 = arith.constant 0 : i32
    %c0_i32_0 = arith.constant 0 : i32
    %c0_i32_1 = arith.constant 0 : i32
    return %c0_i32, %c0_i32_0 : i32, i32
  }
  func.func @transform_3(%arg0: i32) -> (i32, i32) {
    %c0_i32 = arith.constant 0 : i32
    %c0_i32_0 = arith.constant 0 : i32
    %c0_i32_1 = arith.constant 0 : i32
    return %c0_i32, %c0_i32_0 : i32, i32
  }
  func.func @transform_4(%arg0: i32) -> (i32, i32) {
    %c0_i32 = arith.constant 0 : i32
    %c0_i32_0 = arith.constant 0 : i32
    %c0_i32_1 = arith.constant 0 : i32
    return %c0_i32, %c0_i32_0 : i32, i32
  }
  func.func @transform_5(%arg0: i32) -> (i32, i32, i32) {
    %c0_i32 = arith.constant 0 : i32
    %c0_i32_0 = arith.constant 0 : i32
    %c0_i32_1 = arith.constant 0 : i32
    return %arg0, %c0_i32, %c0_i32_0 : i32, i32, i32
  }
}

</mosaic_0001>

<bundles_post_ra>
// kernel: tpu_custom_call.1
= control target key start
LH: loop header
LB: loop body
LE: loop exit
PB: predicated region body
PF: predicated region fallthrough
CT: control target
= control target key end

     0   :  { %s940_s0 = inlined_call_operand.vmem [shape: bf16[384,64], index: 0, kind: input, shape index: {}]   ;;  %s941_s1 = inlined_call_operand.vmem [shape: bf16[64,64], index: 1, kind: input, shape index: {}]   ;;  %s942_s2 = inlined_call_operand.vmem [shape: f32[1,64], index: 2, kind: input, shape index: {}]   ;;  %s943_s3 = inlined_call_operand.vmem [shape: f32[1,64], index: 3, kind: input, shape index: {}]   ;;  %s944_s4 = inlined_call_operand.<no memory space> [shape: f32[1,1], index: 4, kind: input, shape index: {}]   ;;  %s945_s5 = inlined_call_operand.hbm [shape: f32[3,1,128], index: 5, kind: output, shape index: {}]  }
   0x1   :  { %10 = sst [smem:[#allocation2]] %s944_s4 }
   0x2   :  { %11 = vsyncpa [#allocation4], 0 }
   0x3   :  { %13 = vsyncpa [#allocation4 + $0x1], 0  ;;  %s813_s20 = smov 0   ;;  %s815_s21 = smov 0  }
   0x4   :  { %s817_s22 = smov 0   ;;  %s819_s23 = smov 0  }
   0x5 LB: > { %s834_s4 = sadd.s32 4294967295, %s778_s23   ;;  %s570_s24 = sadd.s32 4294967294, %s778_s23   ;;  %s778_s23 = sphi %s819_s23, %s951_s23   ;;  %s774_s22 = sphi %s817_s22, %s950_s22   ;;  %s770_s21 = sphi %s815_s21, %s949_s21   ;;  %s766_s20 = sphi %s813_s20, %s948_s20  }
   0x6   : > { %s838_s25 = sadd.s32 1, %s778_s23   ;;  %s136_s26 = sadd.s32 1, %s774_s22 }
   0x7   : > { %s133_s27 = ssub.s32 %s778_s23, %s838_s25  ;;  %p146_p0 = scmp.ne.s32.totalorder %s774_s22, %s770_s21 }
   0x8   : > { %p134_p1 = scmp.eq.s32.totalorder %s133_s27, 0  ;;  %p147_p2 = scmp.eq.s32.totalorder %s834_s4, 2 }
   0x9   : > { %p152_p3 = scmp.ne.s32.totalorder %s770_s21, %s766_s20  ;;  %p153_p4 = scmp.eq.s32.totalorder %s570_s24, 2 }
   0xa   : > { %s849_s28 = scalar_select %p134_p1, %s774_s22, %s136_s26  }
   0xb   : > { %p851_p5 = por %p147_p2, %p146_p0  ;;  %p855_p6 = por %p153_p4, %p152_p3 }
   0xc   : > { %p573_p7 = scmp.ge.s32.totalorder %s778_s23, 1  ;;  %p192_p8 = scmp.lt.s32.totalorder %s778_s23, 4 }
   0xe   : > { %p193_p9 = pnand %p573_p7, %p192_p8 }
   0xf   : > { %s574_s8 = sshll.u32 (!%p193_p9), %s834_s4, 4  ;;  %s409_s6 = sld [smem:[#allocation2]] (!%p193_p9) }
  0x10   : > { %196 = sbr.rel (%p193_p9) target bundleno = 419 (0x1a3), region = 40  ;;  %p220_p10 = scmp.lt.s32.totalorder (!%p193_p9), %s574_s8, 47 }
  0x11   : > { %s217_s7 = sand.u32 (!%p193_p9), 1, %s770_s21   ;;  %s511_s10 = scalar_lea.hbm (!%p193_p9), %s945_s5, %s834_s4 }
  0x12   : > { %s218_s11 = scalar_lea.vmem (!%p193_p9), [#allocation3], %s217_s7  ;;  %s503_s14 = scalar_lea.sflag (!%p193_p9), [#allocation4], %s217_s7 }
  0x13   : > { %s513_s12 = sshll.u32 (!%p193_p9), %s218_s11, 4  ;;  %s514_s12 = int_to_ptr.vmem [resolvable:$true] %s513_s12 }
  0x15   : > { %v663_v0 = vld [vmem:[%s941_s1 + $0x18] sm:$0xff]  ;;  %v662_v1 = vld [vmem:[%s941_s1 + $0x10] sm:$0xff]  ;;  %s953_s8 = smov (!%p220_p10, %s574_s8), 47  ;;  %v661_v2 = vld [vmem:[%s941_s1 + $0x8] sm:$0xff]  ;;  %vm318_vm0 = vcmask 523264   ;;  %v410_v62 = vstv %s409_s6 }
  0x16   : > { %664 = vmatpush.bf16.msra.mxu2 %v663_v0  ;;  %665 = vmatpush.bf16.msra.mxu3 %v663_v0  ;;  %s575_s13 = sshll.u32 %s953_s8, 2  ;;  %v660_v3 = vld [vmem:[%s941_s1] sm:$0xff] }
  0x17   : > { %347 = vmatpush.bf16.msra.mxu0 %v663_v0  ;;  %s223_s18 = scalar_lea.vmem %s940_s0, %s575_s13  ;;  %v711_v20 = vld [vmem:[%s942_s2] ss:$0 sm:$0xff]  ;;  %s515_s13 = sshll.u32 %s511_s10, 4  ;;  %s516_s13 = int_to_ptr.hbm [resolvable:$true] %s515_s13 }
  0x18   : > { %v655_v4 = vld [vmem:[%s223_s18 + $0x18] sm:$0xff]  ;;  %v658_v5 = vld [vmem:[%s223_s18 + $0x30] sm:$0xff]  ;;  %v652_v6 = vld [vmem:[%s223_s18] sm:$0xff]  ;;  %s730_s4 = sshra.s32 %s516_s13, 4  ;;  %s731_s4 = int_to_ptr.hbm [resolvable:$true] %s730_s4 }
  0x19   : > { %v656_v7 = vld [vmem:[%s223_s18 + $0x20] sm:$0xff]  ;;  %v659_v8 = vld [vmem:[%s223_s18 + $0x38] sm:$0xff]  ;;  %v653_v9 = vld [vmem:[%s223_s18 + $0x8] sm:$0xff]  ;;  %s732_s15 = scalar_lea.hbm %s731_s4, 1  ;;  %p737_p0 = scmp.lt.s32.totalorder %s731_s4, %s945_s5 }
  0x1a   : > { %666 = vmatpush.bf16.msra.mxu2 %v662_v1  ;;  %667 = vmatpush.bf16.msra.mxu3 %v662_v1  ;;  %v657_v10 = vld [vmem:[%s223_s18 + $0x28] sm:$0xff]  ;;  %v654_v11 = vld [vmem:[%s223_s18 + $0x10] sm:$0xff]  ;;  %v408_v61 = vld [vmem:[%s943_s3] sm:$0x1]  ;;  %p733_p11 = scmp.ne.s32.totalorder %s731_s4, %s732_s15  ;;  %s736_s18 = scalar_lea.hbm %s945_s5, 3 }
  0x1b   : > { %348 = vmatpush.bf16.msra.mxu0 %v662_v1  ;;  %p738_p1 = scmp.lt.s32.totalorder %s736_s18, %s732_s15 }
  0x1c   : > { %p734_p12 = pnand %p733_p11, %p851_p5 }
  0x1d   : > { %p739_p2 = por %p738_p1, %p737_p0 }
  0x1e   : > { %668 = vmatpush.bf16.msra.mxu2 %v661_v2  ;;  %669 = vmatpush.bf16.msra.mxu3 %v661_v2  ;;  %p735_p13 = pneg %p734_p12 }
  0x1f   : > { %349 = vmatpush.bf16.msra.mxu0 %v661_v2 }
  0x20   : > { %p740_p3 = pnand %p739_p2, %p735_p13 }
  0x22   : > { %670 = vmatpush.bf16.msra.mxu2 %v660_v3  ;;  %671 = vmatpush.bf16.msra.mxu3 %v660_v3 }
  0x23   : > { %350 = vmatpush.bf16.msra.mxu0 %v660_v3 }
  0x25   : > { %627 = vmatmul.msk.bf16.vlgmr.msra.gmra.mxu2 %vm318_vm0, %v655_v4  ;;  %630 = vmatmul.msk.bf16.vlgmr.msra.gmra.mxu3 %vm318_vm0, %v658_v5 }
  0x26   : > { %624 = vmatmul.msk.bf16.vlgmr.msra.gmra.mxu0 %vm318_vm0, %v652_v6 }
  0x35   : > { %628 = vmatmul.msk.bf16.gmra.mxu2 %vm318_vm0, %v656_v7  ;;  %631 = vmatmul.msk.bf16.gmra.mxu3 %vm318_vm0, %v659_v8 }
  0x36   : > { %625 = vmatmul.msk.bf16.gmra.mxu0 %vm318_vm0, %v653_v9 }
  0x45   : > { %629 = vmatmul.msk.bf16.gmra.mxu2 %vm318_vm0, %v657_v10 }
  0x46   : > { %626 = vmatmul.msk.bf16.gmra.mxu0 %vm318_vm0, %v654_v11 }
  0xa3   : > { %v352_v16 = vpop.f32.mrf.mxu0 }
  0xa4   : > { %v353_v58 = vadd.f32 %v711_v20, %v352_v16 }
  0xa6   : > { %v392_v60 = vmax.f32 %v353_v58, 0.0 }
  0xa8   : > { %v367_v12 = vpop.f32.mrf.mxu2  ;;  %v382_v13 = vpop.f32.mrf.mxu3 }
  0xa9   : > { %v383_v30 = vadd.f32 %v711_v20, %v382_v13  ;;  %v368_v45 = vadd.f32 %v711_v20, %v367_v12 }
  0xab   : > { %v354_v19 = vpop.f32.mrf.mxu0  ;;  %v404_v32 = vmax.f32 %v383_v30, 0.0  ;;  %v398_v48 = vmax.f32 %v368_v45, 0.0 }
  0xac   : > { %v355_v56 = vadd.f32 %v711_v20, %v354_v19 }
  0xae   : > { %v393_v59 = vmax.f32 %v355_v56, 0.0 }
  0xb0   : > { %v369_v14 = vpop.f32.mrf.mxu2  ;;  %v384_v15 = vpop.f32.mrf.mxu3 }
  0xb1   : > { %v385_v27 = vadd.f32 %v711_v20, %v384_v15  ;;  %v370_v43 = vadd.f32 %v711_v20, %v369_v14 }
  0xb3   : > { %v357_v26 = vpop.f32.mrf.mxu0  ;;  %v405_v31 = vmax.f32 %v385_v27, 0.0  ;;  %v399_v46 = vmax.f32 %v370_v43, 0.0 }
  0xb4   : > { %v358_v54 = vadd.f32 %v711_v20, %v357_v26 }
  0xb6   : > { %v394_v57 = vmax.f32 %v358_v54, 0.0 }
  0xb8   : > { %v372_v17 = vpop.f32.mrf.mxu2  ;;  %v387_v18 = vpop.f32.mrf.mxu3 }
  0xb9   : > { %v388_v24 = vadd.f32 %v711_v20, %v387_v18  ;;  %v373_v41 = vadd.f32 %v711_v20, %v372_v17 }
  0xbb   : > { %v406_v28 = vmax.f32 %v388_v24, 0.0  ;;  %v359_v33 = vpop.f32.mrf.mxu0  ;;  %v400_v44 = vmax.f32 %v373_v41, 0.0 }
  0xbc   : > { %v360_v52 = vadd.f32 %v711_v20, %v359_v33 }
  0xbe   : > { %v395_v55 = vmax.f32 %v360_v52, 0.0 }
  0xc0   : > { %v374_v21 = vpop.f32.mrf.mxu2  ;;  %v389_v22 = vpop.f32.mrf.mxu3 }
  0xc1   : > { %v390_v23 = vadd.f32 %v711_v20, %v389_v22  ;;  %v375_v38 = vadd.f32 %v711_v20, %v374_v21 }
  0xc3   : > { %v407_v25 = vmax.f32 %v390_v23, 0.0  ;;  %v362_v40 = vpop.f32.mrf.mxu0  ;;  %v401_v42 = vmax.f32 %v375_v38, 0.0 }
  0xc4   : > { %v363_v50 = vadd.f32 %v711_v20, %v362_v40 }
  0xc5   : > { %632 = vmatpush.xpose.msk.msra.mxu1 %vm318_vm0, %v407_v25 }
  0xc6   : > { %v396_v53 = vmax.f32 %v363_v50, 0.0 }
  0xc8   : > { %v377_v29 = vpop.f32.mrf.mxu2 }
  0xc9   : > { %633 = vmatpush.xpose.msk.msra.mxu1 %vm318_vm0, %v406_v28  ;;  %v378_v36 = vadd.f32 %v711_v20, %v377_v29 }
  0xcb   : > { %v402_v39 = vmax.f32 %v378_v36, 0.0  ;;  %v364_v47 = vpop.f32.mrf.mxu0 }
  0xcc   : > { %v365_v49 = vadd.f32 %v711_v20, %v364_v47 }
  0xcd   : > { %634 = vmatpush.xpose.msk.msra.mxu1 %vm318_vm0, %v405_v31 }
  0xce   : > { %v397_v51 = vmax.f32 %v365_v49, 0.0 }
  0xd0   : > { %v379_v34 = vpop.f32.mrf.mxu2 }
  0xd1   : > { %v380_v35 = vadd.f32 %v711_v20, %v379_v34  ;;  %635 = vmatpush.xpose.msk.msra.mxu1 %vm318_vm0, %v404_v32 }
  0xd3   : > { %v403_v37 = vmax.f32 %v380_v35, 0.0 }
  0xd5   : > { %636 = vmatpush.xpose.msk.msra.mxu1 %vm318_vm0, %v403_v37 }
  0xd9   : > { %637 = vmatpush.xpose.msk.msra.mxu1 %vm318_vm0, %v402_v39 }
  0xdd   : > { %638 = vmatpush.xpose.msk.msra.mxu1 %vm318_vm0, %v401_v42 }
  0xe1   : > { %639 = vmatpush.xpose.msk.msra.mxu1 %vm318_vm0, %v400_v44 }
  0xe5   : > { %640 = vmatpush.xpose.msk.msra.mxu1 %vm318_vm0, %v399_v46 }
  0xe9   : > { %641 = vmatpush.xpose.msk.msra.mxu1 %vm318_vm0, %v398_v48 }
  0xed   : > { %642 = vmatpush.xpose.msk.msra.mxu1 %vm318_vm0, %v397_v51 }
  0xf1   : > { %643 = vmatpush.xpose.msk.msra.mxu1 %vm318_vm0, %v396_v53 }
  0xf5   : > { %644 = vmatpush.xpose.msk.msra.mxu1 %vm318_vm0, %v395_v55 }
  0xf9   : > { %645 = vmatpush.xpose.msk.msra.mxu1 %vm318_vm0, %v394_v57 }
  0xfd   : > { %646 = vmatpush.xpose.msk.msra.mxu1 %vm318_vm0, %v393_v59 }
 0x101   : > { %647 = vmatpush.xpose.msk.msra.mxu1 %vm318_vm0, %v392_v60 }
 0x104   : > { %648 = vmatmul.msk.f32.vlgmr.msra.gmra.mxu1 %vm318_vm0, %v408_v61 }
 0x181   : > { %v479_v63 = vpop.f32.mrf.mxu1 }
 0x182   : > { %v480_v0 = vadd.f32 %v479_v63, %v410_v62 }
 0x184   : > { %v649_v1 = vmul.f32 -1.442695, %v480_v0 }
 0x186   : > { %712 = vpow2.f32 %v649_v1 }
 0x18c   : > { %v713_v2 = vpop.eup %712 }
 0x18d   : > { %v485_v3 = vadd.f32 1.0, %v713_v2 }
 0x18f   : > { %714 = vrcp.f32 %v485_v3  ;;  %v497_v7 = vand.u32 2147483648, %v485_v3  ;;  %v495_v9 = vand.u32 2147483647, %v485_v3  ;;  %vm491_vm2 = vweird.f32 %v485_v3 }
 0x191   : > { %v498_v11 = vor.u32 1.1754944e-38, %v497_v7  ;;  %vm496_vm4 = vcmp.eq.f32.partialorder %v495_v9, 8.507059e+37 }
 0x195   : > { %v715_v4 = vpop.eup %714 }
 0x196   : > { %v487_v5 = vmul.f32 %v715_v4, %v485_v3  ;;  %vm492_vm1 = vweird.f32 %v715_v4 }
 0x197   : > { %vm493_vm3 = vmor %vm491_vm2, %vm492_vm1 }
 0x198   : > { %v488_v6 = vsub.f32 1.0, %v487_v5 }
 0x19a   : > { %v489_v8 = vmul.f32 %v715_v4, %v488_v6 }
 0x19c   : > { %v490_v10 = vadd.f32 %v715_v4, %v489_v8 }
 0x19e   : > { %v494_v12 = vsel %vm493_vm3, %v715_v4, %v490_v10 }
 0x19f   : > { %v499_v13 = vsel %vm496_vm4, %v498_v11, %v494_v12 }
 0x1a0   : > { %501 = vst [vmem:[%s218_s11] sm:$0x1] %v499_v13 }
 0x1a1   : > { %743 = shalt.err (!%p740_p3)
}
 0x1a2   : > { %672 = dma.vmem_to_hbm [thread:$0]  (%p851_p5), %s514_s12, 16, %s516_s13, %s503_s14  }
 0x1a3 PF: > { %p678_p4 = scmp.ge.s32.totalorder %s778_s23, 2  ;;  %s527_s26 = sand.u32 1, %s766_s20  }
 0x1a4   : > { %s528_s27 = scalar_lea.sflag [#allocation4], %s527_s26 }
 0x1a5   : > { %p675_p7 = pnand %p678_p4, %p855_p6 }
 0x1a7   : > { %p676_p8 = pneg %p675_p7 }
 0x1a9   : > { %761 = dma.done.wait (%p676_p8), %s528_s27, 16  }
 0x1aa   : > { %763 = vsyncadd (%p676_p8), %s528_s27, 4294967280  ;;  %p16_p9 = scmp.ge.s32.totalorder %s838_s25, 5   ;;  %s948_s20 = smov %s770_s21 }
 0x1ab   : > { %s949_s21 = smov %s774_s22  ;;  %s950_s22 = smov %s849_s28 }
 0x1ac   : > { %s951_s23 = smov %s838_s25  ;;  %18 = sbr.rel (!%p16_p9) target bundleno = 5 (0x5), region = 75 }
 0x1b1   :  { %533 = vsyncpa [#allocation4], 1 }
 0x1b2   :  { %535 = vsyncpa [#allocation4 + $0x1], 1 }

</bundles_post_ra>
